<compile_context>
chip_gen: v5e
topology: v5e:2x2
jax: 0.10.0
libtpu: 0.0.40
codegen_flags: <defaults>
</compile_context>

<pallas_src>
import jax
import jax.numpy as jnp
from jax.experimental import pallas as pl
from jax.experimental.pallas import tpu as pltpu

IN_F = 48
HID_F = 48
OUT_F = 10

# Default batch tile: large enough to sit near the HBM roofline on all
# generations, small enough that double-buffered input+output tiles stay well
# inside the requested VMEM limit (f32 batch-major: ~16 MiB at tb=8192).
DEFAULT_BLOCK_B = 8192
VMEM_LIMIT_BYTES = 48 * 1024 * 1024  # safe on v5e/v6e (128 MiB) and v7x (64 MiB)


def _round_up(n, m):
    return ((n + m - 1) // m) * m


def _batch_axis_semantics():
    # Engage both TensorCores on v7x; single-TC generations use "parallel".
    try:
        kind = jax.devices()[0].device_kind.lower()
    except Exception:
        kind = ""
    if "v7" in kind or "tpu7" in kind:
        return (pltpu.CORE_PARALLEL,)
    return ("parallel",)


def _mlp_batch_major_kernel(x_ref, w1_ref, b1_ref, w2_ref, b2_ref, o_ref):
    # x:(tb,48) @ W1^T:(48,48) -> h:(tb,48); ReLU; h @ W2^T:(48,10) -> (tb,10)
    h = jnp.dot(x_ref[...], w1_ref[...],
                preferred_element_type=jnp.float32) + b1_ref[...]
    h = jnp.maximum(h, 0.0)                       # ReLU in f32 (v5e-safe)
    y = jnp.dot(h, w2_ref[...].astype(jnp.float32),
                preferred_element_type=jnp.float32) + b2_ref[...]
    o_ref[...] = y.astype(o_ref.dtype)


def _mlp_feature_major_kernel(x_ref, w1_ref, b1_ref, w2_ref, b2_ref, o_ref):
    # Lane-dense layout: W1:(48,48) @ x^T:(48,tb) -> h:(48,tb); ReLU;
    # W2:(10,48) @ h -> y^T:(10,tb). Batch tile sits on the 128-lane axis.
    h = jnp.dot(w1_ref[...], x_ref[...],
                preferred_element_type=jnp.float32) + b1_ref[...]
    h = jnp.maximum(h, 0.0)
    y = jnp.dot(w2_ref[...].astype(jnp.float32), h,
                preferred_element_type=jnp.float32) + b2_ref[...]
    o_ref[...] = y.astype(o_ref.dtype)


def two_layer_nn(x, w1, b1, w2, b2, *, block_b=DEFAULT_BLOCK_B,
                 feature_major=False):
    """TwoLayerNN forward: fc2(relu(fc1(x))).

    Weights use the torch layout: w1 (48, 48) = (out, in), b1 (48,),
    w2 (10, 48), b2 (10,).

    feature_major=False: x is (B, 48), returns (B, 10).
    feature_major=True : x is (48, B) (already feature-major upstream),
                         returns (10, B) — lane-dense, maximum-bandwidth path.

    x's dtype (f32 or bf16) is streamed as-is; matmuls accumulate in f32 and
    the output has x's dtype.
    """
    x_dtype = x.dtype
    out_dtype = x_dtype
    w_dtype = jnp.bfloat16 if x_dtype == jnp.bfloat16 else jnp.float32

    if feature_major:
        assert x.ndim == 2 and x.shape[0] == IN_F
        B = x.shape[1]
        tb = max(128, min(_round_up(block_b, 128), _round_up(B, 128)))
        grid = (pl.cdiv(B, tb),)
        w1k = w1.astype(w_dtype)                       # (48, 48): h^T = W1 @ x^T
        w2k = w2.astype(w_dtype)                       # (10, 48)
        b1k = b1.astype(jnp.float32).reshape(HID_F, 1)
        b2k = b2.astype(jnp.float32).reshape(OUT_F, 1)
        kernel = _mlp_feature_major_kernel
        x_spec = pl.BlockSpec((IN_F, tb), lambda i: (0, i))
        out_spec = pl.BlockSpec((OUT_F, tb), lambda i: (0, i))
        out_shape = jax.ShapeDtypeStruct((OUT_F, B), out_dtype)
    else:
        assert x.ndim == 2 and x.shape[1] == IN_F
        B = x.shape[0]
        tb = max(8, min(_round_up(block_b, 8), _round_up(B, 8)))
        grid = (pl.cdiv(B, tb),)
        w1k = w1.T.astype(w_dtype)                     # (48, 48): h = x @ W1^T
        w2k = w2.T.astype(w_dtype)                     # (48, 10)
        b1k = b1.astype(jnp.float32).reshape(1, HID_F)
        b2k = b2.astype(jnp.float32).reshape(1, OUT_F)
        kernel = _mlp_batch_major_kernel
        x_spec = pl.BlockSpec((tb, IN_F), lambda i: (i, 0))
        out_spec = pl.BlockSpec((tb, OUT_F), lambda i: (i, 0))
        out_shape = jax.ShapeDtypeStruct((B, OUT_F), out_dtype)

    # Weights / biases: constant index maps -> fetched once, VMEM-resident.
    const = lambda a: pl.BlockSpec(a.shape, lambda i: (0, 0))

    x_elt = jnp.dtype(x_dtype).itemsize
    o_elt = jnp.dtype(out_dtype).itemsize
    w_elt = jnp.dtype(w_dtype).itemsize
    cost = pl.CostEstimate(
        flops=2 * B * (IN_F * HID_F + HID_F * OUT_F),
        transcendentals=0,
        bytes_accessed=(B * IN_F * x_elt + B * OUT_F * o_elt
                        + (IN_F * HID_F + HID_F * OUT_F) * w_elt
                        + (HID_F + OUT_F) * 4),
    )

    return pl.pallas_call(
        kernel,
        out_shape=out_shape,
        grid=grid,
        in_specs=[x_spec, const(w1k), const(b1k), const(w2k), const(b2k)],
        out_specs=out_spec,
        compiler_params=pltpu.CompilerParams(
            dimension_semantics=_batch_axis_semantics(),
            vmem_limit_bytes=VMEM_LIMIT_BYTES,
        ),
        cost_estimate=cost,
    )(x, w1k, b1k, w2k, b2k)


def init_params(key):
    # Deterministic init mirroring nn.Linear defaults: U(-1/sqrt(fan_in), +),
    # stored in torch layout (out_features, in_features).
    k1, k2, k3, k4 = jax.random.split(key, 4)
    bnd1 = 1.0 / jnp.sqrt(jnp.float32(IN_F))
    bnd2 = 1.0 / jnp.sqrt(jnp.float32(HID_F))
    w1 = jax.random.uniform(k1, (HID_F, IN_F), jnp.float32, -bnd1, bnd1)
    b1 = jax.random.uniform(k2, (HID_F,), jnp.float32, -bnd1, bnd1)
    w2 = jax.random.uniform(k3, (OUT_F, HID_F), jnp.float32, -bnd2, bnd2)
    b2 = jax.random.uniform(k4, (OUT_F,), jnp.float32, -bnd2, bnd2)
    return w1, b1, w2, b2


def _ref(x, w1, b1, w2, b2):
    return jnp.maximum(x @ w1.T + b1, 0.0) @ w2.T + b2


if __name__ == "__main__":
    key = jax.random.PRNGKey(0)
    kx1, kx2, kx3, kp = jax.random.split(key, 4)
    w1, b1, w2, b2 = init_params(kp)

    # A) Small exact-tile batch-major f32 check.
    x = jax.random.normal(kx1, (8, IN_F), jnp.float32)
    out = jax.block_until_ready(two_layer_nn(x, w1, b1, w2, b2))
    assert out.shape == (8, OUT_F)
    assert jnp.allclose(out, _ref(x, w1, b1, w2, b2), atol=1e-5, rtol=1e-5)

    # B) Ragged last tile, no wrapper padding: B=100, tb=64 -> grid=(2,),
    #    Pallas masks the partial final block.
    xb = jax.random.normal(kx2, (100, IN_F), jnp.float32)
    outb = jax.block_until_ready(two_layer_nn(xb, w1, b1, w2, b2, block_b=64))
    assert outb.shape == (100, OUT_F)
    assert jnp.allclose(outb, _ref(xb, w1, b1, w2, b2), atol=1e-5, rtol=1e-5)

    # C) Lane-dense feature-major path: x supplied as (48, B), output (10, B).
    xt = xb.T  # stands in for data that is already feature-major upstream
    outc = jax.block_until_ready(
        two_layer_nn(xt, w1, b1, w2, b2, block_b=128, feature_major=True))
    assert outc.shape == (OUT_F, 100)
    assert jnp.allclose(outc.T, _ref(xb, w1, b1, w2, b2), atol=1e-5, rtol=1e-5)

    # D) Caller-provided bf16 x (no wrapper cast); f32 accumulation inside.
    xd = jax.random.normal(kx3, (64, IN_F), jnp.float32).astype(jnp.bfloat16)
    outd = jax.block_until_ready(two_layer_nn(xd, w1, b1, w2, b2))
    refd = _ref(xd.astype(jnp.float32), w1, b1, w2, b2)
    assert outd.shape == (64, OUT_F)
    assert jnp.allclose(outd.astype(jnp.float32), refd, atol=5e-2, rtol=5e-2)

    print("KERNEL_OK")
</pallas_src>

<mosaic_0001>
module attributes {stable_mosaic.version = 11 : i64} {
  func.func @_mlp_batch_major_kernel(%arg0: i32, %arg1: memref<8x48xf32, #tpu.memory_space<vmem>>, %arg2: memref<48x48xf32, #tpu.memory_space<vmem>>, %arg3: memref<1x48xf32, #tpu.memory_space<vmem>>, %arg4: memref<48x10xf32, #tpu.memory_space<vmem>>, %arg5: memref<1x10xf32, #tpu.memory_space<vmem>>, %arg6: memref<8x10xf32, #tpu.memory_space<vmem>>) attributes {dimension_semantics = [#tpu.dimension_semantics<parallel>], iteration_bounds = array<i64: 1>, scalar_prefetch = 0 : i64, scratch_operands = 0 : i64, tpu.core_type = #tpu.core_type<tc>, window_params = [{transform_indices = @transform_0, window_bounds = array<i64: 8, 48>}, {pipeline_mode = #tpu.pipeline_mode<synchronous>, transform_indices = @transform_1, window_bounds = array<i64: 48, 48>}, {pipeline_mode = #tpu.pipeline_mode<synchronous>, transform_indices = @transform_2, window_bounds = array<i64: 1, 48>}, {pipeline_mode = #tpu.pipeline_mode<synchronous>, transform_indices = @transform_3, window_bounds = array<i64: 48, 10>}, {pipeline_mode = #tpu.pipeline_mode<synchronous>, transform_indices = @transform_4, window_bounds = array<i64: 1, 10>}, {transform_indices = @transform_5, window_bounds = array<i64: 8, 10>}]} {
    %c0 = arith.constant 0 : index
    %c0_0 = arith.constant 0 : index
    %0 = vector.load %arg1[%c0, %c0_0] : memref<8x48xf32, #tpu.memory_space<vmem>>, vector<8x48xf32>
    %c0_1 = arith.constant 0 : index
    %c0_2 = arith.constant 0 : index
    %1 = vector.load %arg2[%c0_1, %c0_2] : memref<48x48xf32, #tpu.memory_space<vmem>>, vector<48x48xf32>
    %cst = arith.constant dense<0.000000e+00> : vector<8x48xf32>
    %2 = tpu.matmul %0, %1, %cst {dimension_numbers = #tpu.dot_dimension_numbers<[1], [0], [0], [1], [0, 0, 1, 1], [], []>} : vector<8x48xf32>, vector<48x48xf32>, vector<8x48xf32> -> vector<8x48xf32>
    %c0_3 = arith.constant 0 : index
    %c0_4 = arith.constant 0 : index
    %3 = vector.load %arg3[%c0_3, %c0_4] : memref<1x48xf32, #tpu.memory_space<vmem>>, vector<1x48xf32>
    %4 = vector.broadcast %3 : vector<1x48xf32> to vector<8x48xf32>
    %5 = arith.addf %2, %4 : vector<8x48xf32>
    %cst_5 = arith.constant 0.000000e+00 : f32
    %6 = vector.broadcast %cst_5 : f32 to vector<8x48xf32>
    %7 = arith.maximumf %5, %6 : vector<8x48xf32>
    %c0_6 = arith.constant 0 : index
    %c0_7 = arith.constant 0 : index
    %8 = vector.load %arg4[%c0_6, %c0_7] : memref<48x10xf32, #tpu.memory_space<vmem>>, vector<48x10xf32>
    %cst_8 = arith.constant dense<0.000000e+00> : vector<8x10xf32>
    %9 = tpu.matmul %7, %8, %cst_8 {dimension_numbers = #tpu.dot_dimension_numbers<[1], [0], [0], [1], [0, 0, 1, 1], [], []>} : vector<8x48xf32>, vector<48x10xf32>, vector<8x10xf32> -> vector<8x10xf32>
    %c0_9 = arith.constant 0 : index
    %c0_10 = arith.constant 0 : index
    %10 = vector.load %arg5[%c0_9, %c0_10] : memref<1x10xf32, #tpu.memory_space<vmem>>, vector<1x10xf32>
    %11 = vector.broadcast %10 : vector<1x10xf32> to vector<8x10xf32>
    %12 = arith.addf %9, %11 : vector<8x10xf32>
    %c0_11 = arith.constant 0 : index
    %c0_12 = arith.constant 0 : index
    %13 = vector.load %arg6[%c0_11, %c0_12] : memref<8x10xf32, #tpu.memory_space<vmem>>, vector<8x10xf32>
    tpu.vector_store %arg6[%c0_11, %c0_12], %12 {strides = array<i32>} : memref<8x10xf32, #tpu.memory_space<vmem>>, vector<8x10xf32>,
    return
  }
  func.func @transform_0(%arg0: i32) -> (i32, i32) {
    %c0_i32 = arith.constant 0 : i32
    %c0_i32_0 = arith.constant 0 : i32
    return %arg0, %c0_i32 : i32, i32
  }
  func.func @transform_1(%arg0: i32) -> (i32, i32) {
    %c0_i32 = arith.constant 0 : i32
    %c0_i32_0 = arith.constant 0 : i32
    %c0_i32_1 = arith.constant 0 : i32
    return %c0_i32, %c0_i32_0 : i32, i32
  }
  func.func @transform_2(%arg0: i32) -> (i32, i32) {
    %c0_i32 = arith.constant 0 : i32
    %c0_i32_0 = arith.constant 0 : i32
    %c0_i32_1 = arith.constant 0 : i32
    return %c0_i32, %c0_i32_0 : i32, i32
  }
  func.func @transform_3(%arg0: i32) -> (i32, i32) {
    %c0_i32 = arith.constant 0 : i32
    %c0_i32_0 = arith.constant 0 : i32
    %c0_i32_1 = arith.constant 0 : i32
    return %c0_i32, %c0_i32_0 : i32, i32
  }
  func.func @transform_4(%arg0: i32) -> (i32, i32) {
    %c0_i32 = arith.constant 0 : i32
    %c0_i32_0 = arith.constant 0 : i32
    %c0_i32_1 = arith.constant 0 : i32
    return %c0_i32, %c0_i32_0 : i32, i32
  }
  func.func @transform_5(%arg0: i32) -> (i32, i32) {
    %c0_i32 = arith.constant 0 : i32
    %c0_i32_0 = arith.constant 0 : i32
    return %arg0, %c0_i32 : i32, i32
  }
}

</mosaic_0001>

<bundles_post_ra>
// kernel: tpu_custom_call.1
= control target key start
LH: loop header
LB: loop body
LE: loop exit
PB: predicated region body
PF: predicated region fallthrough
CT: control target
= control target key end

     0   :  { %s218_s0 = inlined_call_operand.vmem [shape: f32[8,48], index: 0, kind: input, shape index: {}]   ;;  %s219_s1 = inlined_call_operand.vmem [shape: f32[48,48], index: 1, kind: input, shape index: {}]   ;;  %s220_s2 = inlined_call_operand.vmem [shape: f32[1,48], index: 2, kind: input, shape index: {}]   ;;  %s221_s3 = inlined_call_operand.vmem [shape: f32[48,10], index: 3, kind: input, shape index: {}]   ;;  %s222_s4 = inlined_call_operand.vmem [shape: f32[1,10], index: 4, kind: input, shape index: {}]   ;;  %s223_s5 = inlined_call_operand.hbm [shape: f32[8,10], index: 5, kind: output, shape index: {}]  }
   0x1   :  { %v27_v0 = vld [vmem:[%s219_s1 + $0x28] sm:$0xff]  ;;  %v26_v1 = vld [vmem:[%s219_s1 + $0x20] sm:$0xff]  ;;  %v25_v2 = vld [vmem:[%s219_s1 + $0x18] sm:$0xff] }
   0x2   :  { %46 = vmatpush.msra.mxu0 %v27_v0  ;;  %v62_v3 = vld [vmem:[%s221_s3 + $0x28] sm:$0xff]  ;;  %v61_v4 = vld [vmem:[%s221_s3 + $0x20] sm:$0xff]  ;;  %v24_v5 = vld [vmem:[%s219_s1 + $0x10] sm:$0xff] }
   0x3   :  { %80 = vmatpush.msra.mxu1 %v62_v3  ;;  %v60_v6 = vld [vmem:[%s221_s3 + $0x18] sm:$0xff] }
   0x4   :  { %47 = vmatpush.msra.mxu0 %v26_v1 }
   0x5   :  { %10 = vsyncpa [#allocation3], 0  ;;  %81 = vmatpush.msra.mxu1 %v61_v4  ;;  %v23_v7 = vld [vmem:[%s219_s1 + $0x8] sm:$0xff]  ;;  %v22_v8 = vld [vmem:[%s219_s1] sm:$0xff]  ;;  %vm32_vm0 = vcmask 392192   ;;  %s139_s21 = smov [#allocation2]  }
   0x6   :  { %48 = vmatpush.msra.mxu0 %v25_v2  ;;  %v21_v9 = vld [vmem:[%s218_s0] sm:$0xff]  ;;  %v59_v10 = vld [vmem:[%s221_s3 + $0x10] sm:$0xff]  ;;  %v58_v11 = vld [vmem:[%s221_s3 + $0x8] sm:$0xff]  ;;  %s97_s22 = sshll.u32 %s139_s21, 4  ;;  %s99_s25 = sshll.u32 %s223_s5, 4  ;;  %vm90_vm1 = vcmask 80896   ;;  %s98_s22 = int_to_ptr.vmem [resolvable:$true] %s97_s22  ;;  %s100_s25 = int_to_ptr.hbm [resolvable:$true] %s99_s25 }
   0x7   :  { %82 = vmatpush.msra.mxu1 %v60_v6  ;;  %v57_v12 = vld [vmem:[%s221_s3] sm:$0xff] }
   0x8   :  { %49 = vmatpush.msra.mxu0 %v24_v5  ;;  %v111_v13 = vld [vmem:[%s220_s2] ss:$0 sm:$0xff] }
   0x9   :  { %83 = vmatpush.msra.mxu1 %v59_v10  ;;  %v112_v17 = vld [vmem:[%s222_s4] ss:$0 sm:$0xff] }
   0xa   :  { %50 = vmatpush.msra.mxu0 %v23_v7 }
   0xb   :  { %84 = vmatpush.msra.mxu1 %v58_v11 }
   0xc   :  { %51 = vmatpush.msra.mxu0 %v22_v8 }
   0xd   :  { %108 = vmatmul.msk.f32.vlgmr.msra.gmra.mxu0 %vm32_vm0, %v21_v9  ;;  %85 = vmatpush.msra.mxu1 %v57_v12 }
  0x8a   :  { %v53_v14 = vpop.f32.mrf.mxu0 }
  0x8b   :  { %v54_v15 = vadd.f32 %v111_v13, %v53_v14 }
  0x8d   :  { %v56_v16 = vmax.f32 %v54_v15, 0.0 }
  0x8f   :  { %109 = vmatmul.msk.f32.vlgmr.msra.gmra.mxu1 %vm32_vm0, %v56_v16 }
 0x10c   :  { %v87_v18 = vpop.f32.mrf.mxu1 }
 0x10d   :  { %v88_v19 = vadd.f32 %v112_v17, %v87_v18 }
 0x10f   :  { %91 = vst.msk [vmem:[#allocation2] sm:$0xff] %vm90_vm1, %v88_v19 }
 0x110   :  { %102 = dma.vmem_to_hbm [thread:$0]  %s98_s22, 128, %s100_s25, [#allocation3]  }
 0x111   :  { %137 = dma.done.wait [#allocation3], 128  }
 0x112   :  { %138 = vsyncadd [#allocation3], 4294967168 }
 0x113   :  { %107 = vsyncpa [#allocation3], 1 }

</bundles_post_ra>
